<compile_context>
chip_gen: v7x
topology: tpu7x:2x2x1
jax: 0.10.0
libtpu: 0.0.40
codegen_flags: <defaults>
</compile_context>

<pallas_src>
import numpy as np
import jax
import jax.numpy as jnp
from jax.experimental import pallas as pl
from jax.experimental.pallas import tpu as pltpu

IN_DIM = 3 * 28 * 28          # 2352  (equals full array dim -> no pad needed)
HID = 100
NUM_CLASSES = 10
HID_P = 128                   # lane-padded hidden width
NC_P = 128                    # lane-padded classifier width


def _round_up(x, m):
    return ((x + m - 1) // m) * m


def _mlp_body(x_ref, w1_ref, b1_ref, w2_ref, b2_ref, w3_ref, b3_ref, wc_ref):
    # x_ref: bf16 (TB, IN_DIM); weights bf16; biases f32 (1, 128).
    # 1/255 scale is pre-folded into w1.
    h = jnp.dot(x_ref[...], w1_ref[...],
                preferred_element_type=jnp.float32) + b1_ref[...]
    h = jnp.maximum(h, 0.0)
    h = jnp.dot(h.astype(jnp.bfloat16), w2_ref[...],
                preferred_element_type=jnp.float32) + b2_ref[...]
    h = jnp.maximum(h, 0.0)
    h = jnp.dot(h.astype(jnp.bfloat16), w3_ref[...],
                preferred_element_type=jnp.float32) + b3_ref[...]
    h = jnp.maximum(h, 0.0)
    logits = jnp.dot(h.astype(jnp.bfloat16), wc_ref[...],
                     preferred_element_type=jnp.float32)
    return h, logits


def mlp_kernel(x_ref, w1_ref, b1_ref, w2_ref, b2_ref, w3_ref, b3_ref, wc_ref,
               out_ref):
    _, logits = _mlp_body(x_ref, w1_ref, b1_ref, w2_ref, b2_ref, w3_ref,
                          b3_ref, wc_ref)
    out_ref[...] = logits


def mlp_kernel_feat(x_ref, w1_ref, b1_ref, w2_ref, b2_ref, w3_ref, b3_ref,
                    wc_ref, out_ref, feat_ref):
    feat, logits = _mlp_body(x_ref, w1_ref, b1_ref, w2_ref, b2_ref, w3_ref,
                             b3_ref, wc_ref)
    out_ref[...] = logits
    feat_ref[...] = feat


def make_params(key):
    ks = jax.random.split(key, 7)
    # Weights stored as (in, out) so the kernel does x @ W directly
    # (equivalent to torch's x @ W.T with W of shape (out, in)).
    w1 = jax.random.normal(ks[0], (IN_DIM, HID), jnp.float32) * 0.02
    b1 = jax.random.normal(ks[1], (1, HID), jnp.float32) * 0.02
    w2 = jax.random.normal(ks[2], (HID, HID), jnp.float32) * 0.02
    b2 = jax.random.normal(ks[3], (1, HID), jnp.float32) * 0.02
    w3 = jax.random.normal(ks[4], (HID, HID), jnp.float32) * 0.02
    b3 = jax.random.normal(ks[5], (1, HID), jnp.float32) * 0.02
    wc = jax.random.normal(ks[6], (HID, NUM_CLASSES), jnp.float32) * 0.02
    return (w1, b1, w2, b2, w3, b3, wc)


def prepare_params(params):
    """One-time host-side transform: fold 1/255 into w1, pad to lane-dense
    128-wide dims (exact zero padding), cast weights to bf16 (biases stay f32)."""
    w1, b1, w2, b2, w3, b3, wc = params

    def pad_cols(a, n):
        return jnp.pad(a, ((0, 0), (0, n - a.shape[1])))

    def pad_both(a, m, n):
        return jnp.pad(a, ((0, m - a.shape[0]), (0, n - a.shape[1])))

    w1p = pad_cols(w1 * (1.0 / 255.0), HID_P).astype(jnp.bfloat16)
    b1p = pad_cols(b1, HID_P).astype(jnp.float32)
    w2p = pad_both(w2, HID_P, HID_P).astype(jnp.bfloat16)
    b2p = pad_cols(b2, HID_P).astype(jnp.float32)
    w3p = pad_both(w3, HID_P, HID_P).astype(jnp.bfloat16)
    b3p = pad_cols(b3, HID_P).astype(jnp.float32)
    wcp = pad_both(wc, HID_P, NC_P).astype(jnp.bfloat16)
    return (w1p, b1p, w2p, b2p, w3p, b3p, wcp)


def mlp_forward(x_nchw, prepared_params, return_feat=False, tile_b=512):
    """Forward pass. x_nchw: (B, 3, 28, 28) in [0, 255]."""
    B = x_nchw.shape[0]
    # Flatten like torch .view (row-major) and cast to bf16 to halve HBM traffic.
    x_flat = x_nchw.reshape(B, -1).astype(jnp.bfloat16)

    # Batch tile: multiple of 8 sublanes, capped at tile_b; pad ragged batch.
    tb = min(tile_b, _round_up(B, 8))
    b_pad = _round_up(B, tb)
    if b_pad != B:
        x_flat = jnp.pad(x_flat, ((0, b_pad - B), (0, 0)))
    num_tiles = pl.cdiv(b_pad, tb)

    w1p, b1p, w2p, b2p, w3p, b3p, wcp = prepared_params

    x_spec = pl.BlockSpec((tb, IN_DIM), lambda i: (i, 0))
    # Weights/biases: constant index_map -> resident in VMEM across the grid.
    resident = lambda shape: pl.BlockSpec(shape, lambda i: (0, 0))
    in_specs = [
        x_spec,
        resident((IN_DIM, HID_P)), resident((1, HID_P)),
        resident((HID_P, HID_P)),  resident((1, HID_P)),
        resident((HID_P, HID_P)),  resident((1, HID_P)),
        resident((HID_P, NC_P)),
    ]
    out_spec_logits = pl.BlockSpec((tb, NC_P), lambda i: (i, 0))
    out_spec_feat = pl.BlockSpec((tb, HID_P), lambda i: (i, 0))

    cparams = pltpu.CompilerParams(dimension_semantics=("parallel",))
    args = (x_flat, w1p, b1p, w2p, b2p, w3p, b3p, wcp)

    if return_feat:
        out, feat = pl.pallas_call(
            mlp_kernel_feat,
            grid=(num_tiles,),
            in_specs=in_specs,
            out_specs=[out_spec_logits, out_spec_feat],
            out_shape=[
                jax.ShapeDtypeStruct((b_pad, NC_P), jnp.float32),
                jax.ShapeDtypeStruct((b_pad, HID_P), jnp.float32),
            ],
            compiler_params=cparams,
        )(*args)
        return out[:B, :NUM_CLASSES], feat[:B, :HID]

    out = pl.pallas_call(
        mlp_kernel,
        grid=(num_tiles,),
        in_specs=in_specs,
        out_specs=out_spec_logits,
        out_shape=jax.ShapeDtypeStruct((b_pad, NC_P), jnp.float32),
        compiler_params=cparams,
    )(*args)
    return out[:B, :NUM_CLASSES]


def reference_forward(x_nchw, params):
    w1, b1, w2, b2, w3, b3, wc = params
    x = x_nchw.reshape(x_nchw.shape[0], -1).astype(jnp.float32) / 255.0
    h = jnp.maximum(x @ w1 + b1, 0.0)
    h = jnp.maximum(h @ w2 + b2, 0.0)
    h = jnp.maximum(h @ w3 + b3, 0.0)
    return h @ wc, h


if __name__ == "__main__":
    key = jax.random.PRNGKey(0)
    k_params, k_x = jax.random.split(key)
    params = make_params(k_params)
    prepped = prepare_params(params)

    B = 2
    # synthetic "image" batch in [0, 255], NCHW like the PyTorch module expects
    x = jax.random.uniform(k_x, (B, 3, 28, 28), jnp.float32, 0.0, 255.0)

    out, feat = mlp_forward(x, prepped, return_feat=True)
    out = jax.block_until_ready(out)
    feat = jax.block_until_ready(feat)

    logits_only = jax.block_until_ready(mlp_forward(x, prepped, return_feat=False))

    ref_out, ref_feat = reference_forward(x, params)
    assert out.shape == (B, NUM_CLASSES) and feat.shape == (B, HID)
    # bf16 dot operands (f32 accumulation) -> slightly looser tolerance vs f32 ref.
    assert np.allclose(np.asarray(out), np.asarray(ref_out), rtol=2e-2, atol=2e-2)
    assert np.allclose(np.asarray(feat), np.asarray(ref_feat), rtol=2e-2, atol=2e-2)
    # no-feat fast path must agree with the feat-emitting variant
    assert np.allclose(np.asarray(logits_only), np.asarray(out), rtol=1e-5, atol=1e-5)

    print("KERNEL_OK")
</pallas_src>

<mosaic_0001>
module attributes {stable_mosaic.version = 11 : i64} {
  func.func @mlp_kernel_feat(%arg0: i32, %arg1: memref<8x2352xbf16, #tpu.memory_space<vmem>>, %arg2: memref<2352x128xbf16, #tpu.memory_space<vmem>>, %arg3: memref<1x128xf32, #tpu.memory_space<vmem>>, %arg4: memref<128x128xbf16, #tpu.memory_space<vmem>>, %arg5: memref<1x128xf32, #tpu.memory_space<vmem>>, %arg6: memref<128x128xbf16, #tpu.memory_space<vmem>>, %arg7: memref<1x128xf32, #tpu.memory_space<vmem>>, %arg8: memref<128x128xbf16, #tpu.memory_space<vmem>>, %arg9: memref<8x128xf32, #tpu.memory_space<vmem>>, %arg10: memref<8x128xf32, #tpu.memory_space<vmem>>) attributes {dimension_semantics = [#tpu.dimension_semantics<parallel>], iteration_bounds = array<i64: 1>, scalar_prefetch = 0 : i64, scratch_operands = 0 : i64, tpu.core_type = #tpu.core_type<tc>, window_params = [{transform_indices = @transform_0, window_bounds = array<i64: 8, 2352>}, {pipeline_mode = #tpu.pipeline_mode<synchronous>, transform_indices = @transform_1, window_bounds = array<i64: 2352, 128>}, {pipeline_mode = #tpu.pipeline_mode<synchronous>, transform_indices = @transform_2, window_bounds = array<i64: 1, 128>}, {pipeline_mode = #tpu.pipeline_mode<synchronous>, transform_indices = @transform_3, window_bounds = array<i64: 128, 128>}, {pipeline_mode = #tpu.pipeline_mode<synchronous>, transform_indices = @transform_4, window_bounds = array<i64: 1, 128>}, {pipeline_mode = #tpu.pipeline_mode<synchronous>, transform_indices = @transform_5, window_bounds = array<i64: 128, 128>}, {pipeline_mode = #tpu.pipeline_mode<synchronous>, transform_indices = @transform_6, window_bounds = array<i64: 1, 128>}, {pipeline_mode = #tpu.pipeline_mode<synchronous>, transform_indices = @transform_7, window_bounds = array<i64: 128, 128>}, {transform_indices = @transform_8, window_bounds = array<i64: 8, 128>}, {transform_indices = @transform_9, window_bounds = array<i64: 8, 128>}]} {
    %c0 = arith.constant 0 : index
    %c0_0 = arith.constant 0 : index
    %0 = vector.load %arg1[%c0, %c0_0] : memref<8x2352xbf16, #tpu.memory_space<vmem>>, vector<8x2352xbf16>
    %c0_1 = arith.constant 0 : index
    %c0_2 = arith.constant 0 : index
    %1 = vector.load %arg2[%c0_1, %c0_2] : memref<2352x128xbf16, #tpu.memory_space<vmem>>, vector<2352x128xbf16>
    %cst = arith.constant dense<0.000000e+00> : vector<8x128xf32>
    %2 = tpu.matmul %0, %1, %cst {dimension_numbers = #tpu.dot_dimension_numbers<[1], [0], [0], [1], [0, 0, 1, 1], [], []>} : vector<8x2352xbf16>, vector<2352x128xbf16>, vector<8x128xf32> -> vector<8x128xf32>
    %c0_3 = arith.constant 0 : index
    %c0_4 = arith.constant 0 : index
    %3 = vector.load %arg3[%c0_3, %c0_4] : memref<1x128xf32, #tpu.memory_space<vmem>>, vector<1x128xf32>
    %4 = vector.broadcast %3 : vector<1x128xf32> to vector<8x128xf32>
    %5 = arith.addf %2, %4 : vector<8x128xf32>
    %cst_5 = arith.constant 0.000000e+00 : f32
    %6 = vector.broadcast %cst_5 : f32 to vector<8x128xf32>
    %7 = arith.maximumf %5, %6 : vector<8x128xf32>
    %8 = arith.truncf %7 : vector<8x128xf32> to vector<8x128xbf16>
    %c0_6 = arith.constant 0 : index
    %c0_7 = arith.constant 0 : index
    %9 = vector.load %arg4[%c0_6, %c0_7] : memref<128x128xbf16, #tpu.memory_space<vmem>>, vector<128x128xbf16>
    %cst_8 = arith.constant dense<0.000000e+00> : vector<8x128xf32>
    %10 = tpu.matmul %8, %9, %cst_8 {dimension_numbers = #tpu.dot_dimension_numbers<[1], [0], [0], [1], [0, 0, 1, 1], [], []>} : vector<8x128xbf16>, vector<128x128xbf16>, vector<8x128xf32> -> vector<8x128xf32>
    %c0_9 = arith.constant 0 : index
    %c0_10 = arith.constant 0 : index
    %11 = vector.load %arg5[%c0_9, %c0_10] : memref<1x128xf32, #tpu.memory_space<vmem>>, vector<1x128xf32>
    %12 = vector.broadcast %11 : vector<1x128xf32> to vector<8x128xf32>
    %13 = arith.addf %10, %12 : vector<8x128xf32>
    %cst_11 = arith.constant 0.000000e+00 : f32
    %14 = vector.broadcast %cst_11 : f32 to vector<8x128xf32>
    %15 = arith.maximumf %13, %14 : vector<8x128xf32>
    %16 = arith.truncf %15 : vector<8x128xf32> to vector<8x128xbf16>
    %c0_12 = arith.constant 0 : index
    %c0_13 = arith.constant 0 : index
    %17 = vector.load %arg6[%c0_12, %c0_13] : memref<128x128xbf16, #tpu.memory_space<vmem>>, vector<128x128xbf16>
    %cst_14 = arith.constant dense<0.000000e+00> : vector<8x128xf32>
    %18 = tpu.matmul %16, %17, %cst_14 {dimension_numbers = #tpu.dot_dimension_numbers<[1], [0], [0], [1], [0, 0, 1, 1], [], []>} : vector<8x128xbf16>, vector<128x128xbf16>, vector<8x128xf32> -> vector<8x128xf32>
    %c0_15 = arith.constant 0 : index
    %c0_16 = arith.constant 0 : index
    %19 = vector.load %arg7[%c0_15, %c0_16] : memref<1x128xf32, #tpu.memory_space<vmem>>, vector<1x128xf32>
    %20 = vector.broadcast %19 : vector<1x128xf32> to vector<8x128xf32>
    %21 = arith.addf %18, %20 : vector<8x128xf32>
    %cst_17 = arith.constant 0.000000e+00 : f32
    %22 = vector.broadcast %cst_17 : f32 to vector<8x128xf32>
    %23 = arith.maximumf %21, %22 : vector<8x128xf32>
    %24 = arith.truncf %23 : vector<8x128xf32> to vector<8x128xbf16>
    %c0_18 = arith.constant 0 : index
    %c0_19 = arith.constant 0 : index
    %25 = vector.load %arg8[%c0_18, %c0_19] : memref<128x128xbf16, #tpu.memory_space<vmem>>, vector<128x128xbf16>
    %cst_20 = arith.constant dense<0.000000e+00> : vector<8x128xf32>
    %26 = tpu.matmul %24, %25, %cst_20 {dimension_numbers = #tpu.dot_dimension_numbers<[1], [0], [0], [1], [0, 0, 1, 1], [], []>} : vector<8x128xbf16>, vector<128x128xbf16>, vector<8x128xf32> -> vector<8x128xf32>
    %c0_21 = arith.constant 0 : index
    %c0_22 = arith.constant 0 : index
    %27 = vector.load %arg9[%c0_21, %c0_22] : memref<8x128xf32, #tpu.memory_space<vmem>>, vector<8x128xf32>
    tpu.vector_store %arg9[%c0_21, %c0_22], %26 {strides = array<i32>} : memref<8x128xf32, #tpu.memory_space<vmem>>, vector<8x128xf32>,
    %c0_23 = arith.constant 0 : index
    %c0_24 = arith.constant 0 : index
    %28 = vector.load %arg10[%c0_23, %c0_24] : memref<8x128xf32, #tpu.memory_space<vmem>>, vector<8x128xf32>
    tpu.vector_store %arg10[%c0_23, %c0_24], %23 {strides = array<i32>} : memref<8x128xf32, #tpu.memory_space<vmem>>, vector<8x128xf32>,
    return
  }
  func.func @transform_0(%arg0: i32) -> (i32, i32) {
    %c0_i32 = arith.constant 0 : i32
    %c0_i32_0 = arith.constant 0 : i32
    return %arg0, %c0_i32 : i32, i32
  }
  func.func @transform_1(%arg0: i32) -> (i32, i32) {
    %c0_i32 = arith.constant 0 : i32
    %c0_i32_0 = arith.constant 0 : i32
    %c0_i32_1 = arith.constant 0 : i32
    return %c0_i32, %c0_i32_0 : i32, i32
  }
  func.func @transform_2(%arg0: i32) -> (i32, i32) {
    %c0_i32 = arith.constant 0 : i32
    %c0_i32_0 = arith.constant 0 : i32
    %c0_i32_1 = arith.constant 0 : i32
    return %c0_i32, %c0_i32_0 : i32, i32
  }
  func.func @transform_3(%arg0: i32) -> (i32, i32) {
    %c0_i32 = arith.constant 0 : i32
    %c0_i32_0 = arith.constant 0 : i32
    %c0_i32_1 = arith.constant 0 : i32
    return %c0_i32, %c0_i32_0 : i32, i32
  }
  func.func @transform_4(%arg0: i32) -> (i32, i32) {
    %c0_i32 = arith.constant 0 : i32
    %c0_i32_0 = arith.constant 0 : i32
    %c0_i32_1 = arith.constant 0 : i32
    return %c0_i32, %c0_i32_0 : i32, i32
  }
  func.func @transform_5(%arg0: i32) -> (i32, i32) {
    %c0_i32 = arith.constant 0 : i32
    %c0_i32_0 = arith.constant 0 : i32
    %c0_i32_1 = arith.constant 0 : i32
    return %c0_i32, %c0_i32_0 : i32, i32
  }
  func.func @transform_6(%arg0: i32) -> (i32, i32) {
    %c0_i32 = arith.constant 0 : i32
    %c0_i32_0 = arith.constant 0 : i32
    %c0_i32_1 = arith.constant 0 : i32
    return %c0_i32, %c0_i32_0 : i32, i32
  }
  func.func @transform_7(%arg0: i32) -> (i32, i32) {
    %c0_i32 = arith.constant 0 : i32
    %c0_i32_0 = arith.constant 0 : i32
    %c0_i32_1 = arith.constant 0 : i32
    return %c0_i32, %c0_i32_0 : i32, i32
  }
  func.func @transform_8(%arg0: i32) -> (i32, i32) {
    %c0_i32 = arith.constant 0 : i32
    %c0_i32_0 = arith.constant 0 : i32
    return %arg0, %c0_i32 : i32, i32
  }
  func.func @transform_9(%arg0: i32) -> (i32, i32) {
    %c0_i32 = arith.constant 0 : i32
    %c0_i32_0 = arith.constant 0 : i32
    return %arg0, %c0_i32 : i32, i32
  }
}

</mosaic_0001>

<bundles_post_ra>
// kernel: tpu_custom_call.1
= control target key start
LH: loop header
LB: loop body
LE: loop exit
PB: predicated region body
PF: predicated region fallthrough
CT: control target
= control target key end

     0   :  { %15 = vsyncpa [#allocation3], 0  ;;  %s3187_s0 = inlined_call_operand.hbm [shape: bf16[8,2352], index: 0, kind: input, shape index: {}]   ;;  %s3188_s1 = inlined_call_operand.hbm [shape: bf16[2352,128], index: 1, kind: input, shape index: {}]   ;;  %s3189_s2 = inlined_call_operand.vmem [shape: f32[1,128], index: 2, kind: input, shape index: {}]   ;;  %s3190_s3 = inlined_call_operand.hbm [shape: bf16[128,128], index: 3, kind: input, shape index: {}]   ;;  %s3191_s4 = inlined_call_operand.vmem [shape: f32[1,128], index: 4, kind: input, shape index: {}]   ;;  %s3192_s5 = inlined_call_operand.hbm [shape: bf16[128,128], index: 5, kind: input, shape index: {}]   ;;  %s3193_s6 = inlined_call_operand.vmem [shape: f32[1,128], index: 6, kind: input, shape index: {}]   ;;  %s3194_s7 = inlined_call_operand.hbm [shape: bf16[128,128], index: 7, kind: input, shape index: {}]   ;;  %s3195_s8 = inlined_call_operand.hbm [shape: f32[8,128], index: 8, kind: output, shape index: {0}]   ;;  %s3196_s9 = inlined_call_operand.hbm [shape: f32[8,128], index: 9, kind: output, shape index: {1}]  }
   0x1   :  { %16 = vsyncpa [#allocation6], 0 }
   0x2   :  { %17 = vsyncpa [#allocation9], 0 }
   0x3   :  { %18 = vsyncpa [#allocation4], 0 }
   0x4   :  { %19 = vsyncpa [#allocation13], 0  ;;  %s2986_s30 = smov [#allocation5]   ;;  %s2822_s13 = scalar_lea.hbm %s3188_s1, 18816 }
   0x5   :  { %s35_s10 = sshll.u32 %s2986_s30, 4  ;;  %p2823_p0 = scmp.ne.s32.totalorder %s3188_s1, %s2822_s13  ;;  %s36_s10 = int_to_ptr.vmem [resolvable:$true] %s35_s10 }
   0x6   :  { %p2826_p1 = scmp.lt.u32.totalorder %s2822_s13, %s3188_s1 }
   0x8   :  { %p2828_p2 = pnand %p2826_p1, %p2823_p0 }
   0xa   :  { %2831 = shalt.err (!%p2828_p2)
}
   0xb   :  { %s2832_s18 = scalar_lea.vmem %s36_s10, 18816  ;;  %p2837_p4 = scmp.lt.s32.totalorder %s36_s10, %s36_s10 }
   0xc   :  { %p2833_p3 = scmp.ne.s32.totalorder %s36_s10, %s2832_s18  ;;  %p2838_p5 = scmp.lt.s32.totalorder %s2832_s18, %s2832_s18 }
   0xe   :  { %p2839_p6 = por %p2838_p5, %p2837_p4 }
  0x10   :  { %p2840_p7 = pnand %p2839_p6, %p2833_p3 }
  0x12   :  { %2843 = shalt.err (!%p2840_p7)
}
  0x13   :  { %s2987_s19 = smov 64   ;;  %s2988_s20 = smov 4  }
  0x14   :  { %41 = dma.hbm_to_vmem [thread:$0]  %s3188_s1, 18816, %s36_s10, [#allocation6], %s2987_s19, %s2987_s19, %s2988_s20  }
  0x15   :  { %s2989_s23 = smov [#allocation8]   ;;  %s2990_s25 = smov [#allocation2]  }
  0x16   :  { %s63_s24 = sshll.u32 %s2989_s23, 4  ;;  %s26_s26 = sshll.u32 %s2990_s25, 4  ;;  %s64_s24 = int_to_ptr.vmem [resolvable:$true] %s63_s24  ;;  %s27_s26 = int_to_ptr.vmem [resolvable:$true] %s26_s26 }
  0x17   :  { %s2844_s29 = scalar_lea.hbm %s3192_s5, 1024 }
  0x18   :  { %p2845_p8 = scmp.ne.s32.totalorder %s3192_s5, %s2844_s29  ;;  %p2848_p9 = scmp.lt.u32.totalorder %s2844_s29, %s3192_s5 }
  0x1a   :  { %p2850_p10 = pnand %p2848_p9, %p2845_p8 }
  0x1c   :  { %2853 = shalt.err (!%p2850_p10)
}
  0x1d   :  { %s2854_s1 = scalar_lea.vmem %s64_s24, 1024  ;;  %p2859_p12 = scmp.lt.s32.totalorder %s64_s24, %s64_s24 }
  0x1e   :  { %p2855_p11 = scmp.ne.s32.totalorder %s64_s24, %s2854_s1  ;;  %p2860_p13 = scmp.lt.s32.totalorder %s2854_s1, %s2854_s1 }
  0x20   :  { %p2861_p0 = por %p2860_p13, %p2859_p12 }
  0x22   :  { %p2862_p1 = pnand %p2861_p0, %p2855_p11 }
  0x24   :  { %2865 = shalt.err (!%p2862_p1)
}
  0x25   :  { %69 = dma.hbm_to_vmem [thread:$0]  %s3192_s5, 1024, %s64_s24, [#allocation9], %s2987_s19, %s2987_s19, %s2988_s20  }
  0x26   :  { %s2866_s17 = scalar_lea.hbm %s3187_s0, 1216 }
  0x27   :  { %p2867_p2 = scmp.ne.s32.totalorder %s3187_s0, %s2866_s17  ;;  %p2870_p3 = scmp.lt.u32.totalorder %s2866_s17, %s3187_s0 }
  0x29   :  { %p2872_p4 = pnand %p2870_p3, %p2867_p2 }
  0x2b   :  { %2875 = shalt.err (!%p2872_p4)
}
  0x2c   :  { %s2876_s25 = scalar_lea.vmem %s27_s26, 1216  ;;  %p2881_p6 = scmp.lt.s32.totalorder %s27_s26, %s27_s26 }
  0x2d   :  { %p2877_p5 = scmp.ne.s32.totalorder %s27_s26, %s2876_s25  ;;  %p2882_p7 = scmp.lt.s32.totalorder %s2876_s25, %s2876_s25 }
  0x2f   :  { %p2883_p8 = por %p2882_p7, %p2881_p6 }
  0x31   :  { %p2884_p9 = pnand %p2883_p8, %p2877_p5 }
  0x33   :  { %2887 = shalt.err (!%p2884_p9)
}
  0x34   :  { %29 = dma.hbm_to_vmem [thread:$0]  %s3187_s0, 1216, %s27_s26, [#allocation3]  }
  0x35   :  { %s2991_s27 = smov [#allocation7]   ;;  %s2992_s29 = smov [#allocation10]  }
  0x36   :  { %s49_s28 = sshll.u32 %s2991_s27, 4  ;;  %s77_s30 = sshll.u32 %s2992_s29, 4  ;;  %s50_s28 = int_to_ptr.vmem [resolvable:$true] %s49_s28  ;;  %s78_s30 = int_to_ptr.vmem [resolvable:$true] %s77_s30 }
  0x37   :  { %s2888_s13 = scalar_lea.hbm %s3190_s3, 1024 }
  0x38   :  { %p2889_p10 = scmp.ne.s32.totalorder %s3190_s3, %s2888_s13  ;;  %p2892_p11 = scmp.lt.u32.totalorder %s2888_s13, %s3190_s3 }
  0x3a   :  { %p2894_p12 = pnand %p2892_p11, %p2889_p10 }
  0x3c   :  { %2897 = shalt.err (!%p2894_p12)
}
  0x3d   :  { %s2898_s0 = scalar_lea.vmem %s50_s28, 1024  ;;  %p2903_p0 = scmp.lt.s32.totalorder %s50_s28, %s50_s28 }
  0x3e   :  { %p2899_p13 = scmp.ne.s32.totalorder %s50_s28, %s2898_s0  ;;  %p2904_p1 = scmp.lt.s32.totalorder %s2898_s0, %s2898_s0 }
  0x40   :  { %p2905_p2 = por %p2904_p1, %p2903_p0 }
  0x42   :  { %p2906_p3 = pnand %p2905_p2, %p2899_p13 }
  0x44   :  { %2909 = shalt.err (!%p2906_p3)
}
  0x45   :  { %55 = dma.hbm_to_vmem [thread:$0]  %s3190_s3, 1024, %s50_s28, [#allocation6], %s2987_s19, %s2987_s19, %s2988_s20  }
  0x46   :  { %s2910_s21 = scalar_lea.hbm %s3194_s7, 1024 }
  0x47   :  { %p2911_p4 = scmp.ne.s32.totalorder %s3194_s7, %s2910_s21  ;;  %p2914_p5 = scmp.lt.u32.totalorder %s2910_s21, %s3194_s7 }
  0x49   :  { %p2916_p6 = pnand %p2914_p5, %p2911_p4 }
  0x4b   :  { %2919 = shalt.err (!%p2916_p6)
}
  0x4c   :  { %s2920_s24 = scalar_lea.vmem %s78_s30, 1024  ;;  %p2925_p8 = scmp.lt.s32.totalorder %s78_s30, %s78_s30 }
  0x4d   :  { %p2921_p7 = scmp.ne.s32.totalorder %s78_s30, %s2920_s24  ;;  %p2926_p9 = scmp.lt.s32.totalorder %s2920_s24, %s2920_s24 }
  0x4f   :  { %p2927_p10 = por %p2926_p9, %p2925_p8 }
  0x51   :  { %p2928_p11 = pnand %p2927_p10, %p2921_p7 }
  0x53   :  { %2931 = shalt.err (!%p2928_p11)
}
  0x54   :  { %83 = dma.hbm_to_vmem [thread:$0]  %s3194_s7, 1024, %s78_s30, [#allocation9], %s2987_s19, %s2987_s19, %s2988_s20  }
  0x55   :  { %2976 = dma.done.wait [#allocation3], 1216  }
  0x56   :  { %2977 = vsyncadd [#allocation3], 4294966080 }
  0x57   :  { %2978 = dma.done.wait [#allocation6], 19840  }
  0x58   :  { %2979 = vsyncadd [#allocation6], 4294947456 }
  0x59   :  { %2980 = dma.done.wait [#allocation9], 2048  }
  0x5a   :  { %2981 = vsyncadd [#allocation9], 4294965248  ;;  %v2632_v0 = vld [vmem:[#allocation5 + $0x40] sm:$0xff]   ;;  %v2636_v4 = vld [vmem:[#allocation5 + $0x48] sm:$0xff]   ;;  %vm2994_vm0 = vmmov 0   ;;  %vm1359_vm1 = vcmask 392192  }
  0x5b   :  { %v2633_v1 = vld [vmem:[#allocation5] sm:$0xff]   ;;  %2322 = vmatprep.subr.bf16.mxu0 %v2632_v0  ;;  %v2637_v5 = vld [vmem:[#allocation5 + $0x8] sm:$0xff]   ;;  %v2640_v8 = vld [vmem:[#allocation5 + $0x50] sm:$0xff]  }
  0x5c   :  { %v2634_v2 = vld [vmem:[#allocation5 + $0xc0] sm:$0xff]   ;;  %2323 = vmatpush3.bf16.msra.mxu0 %v2633_v1  ;;  %v2638_v6 = vld [vmem:[#allocation5 + $0xc8] sm:$0xff]   ;;  %v2641_v9 = vld [vmem:[#allocation5 + $0x10] sm:$0xff]  }
  0x5d   :  { %v2635_v3 = vld [vmem:[#allocation5 + $0x80] sm:$0xff]   ;;  %2344 = vmatprep.subr.bf16.mxu1 %v2634_v2  ;;  %2324 = vmatprep.subr.bf16.mxu0 %v2636_v4  ;;  %v2639_v7 = vld [vmem:[#allocation5 + $0x88] sm:$0xff]   ;;  %v2642_v10 = vld [vmem:[#allocation5 + $0xd0] sm:$0xff]  }
  0x5e   :  { %2345 = vmatpush3.bf16.msra.mxu1 %v2635_v3  ;;  %v2643_v11 = vld [vmem:[#allocation5 + $0x90] sm:$0xff]   ;;  %v2644_v12 = vld [vmem:[#allocation5 + $0x58] sm:$0xff]   ;;  %v2648_v16 = vld [vmem:[#allocation5 + $0x60] sm:$0xff]  }
  0x5f   :  { %2346 = vmatprep.subr.bf16.mxu1 %v2638_v6  ;;  %v2645_v13 = vld [vmem:[#allocation5 + $0x18] sm:$0xff]   ;;  %v2649_v17 = vld [vmem:[#allocation5 + $0x20] sm:$0xff]   ;;  %v2652_v20 = vld [vmem:[#allocation5 + $0x68] sm:$0xff]  }
  0x60   :  { %2325 = vmatpush3.bf16.msra.mxu0 %v2637_v5  ;;  %v2646_v14 = vld [vmem:[#allocation5 + $0xd8] sm:$0xff]   ;;  %v2650_v18 = vld [vmem:[#allocation5 + $0xe0] sm:$0xff]   ;;  %v2653_v21 = vld [vmem:[#allocation5 + $0x28] sm:$0xff]  }
  0x61   :  { %2326 = vmatprep.subr.bf16.mxu0 %v2640_v8  ;;  %v2647_v15 = vld [vmem:[#allocation5 + $0x98] sm:$0xff]   ;;  %v2651_v19 = vld [vmem:[#allocation5 + $0xa0] sm:$0xff]   ;;  %v2654_v22 = vld [vmem:[#allocation5 + $0xe8] sm:$0xff]  }
  0x62   :  { %2347 = vmatpush3.bf16.msra.mxu1 %v2639_v7  ;;  %v2655_v23 = vld [vmem:[#allocation5 + $0xa8] sm:$0xff]   ;;  %v2656_v24 = vld [vmem:[#allocation5 + $0x70] sm:$0xff]   ;;  %v2660_v28 = vld [vmem:[#allocation5 + $0x78] sm:$0xff]  }
  0x63   :  { %2348 = vmatprep.subr.bf16.mxu1 %v2642_v10  ;;  %v2657_v25 = vld [vmem:[#allocation5 + $0x30] sm:$0xff]   ;;  %v2661_v29 = vld [vmem:[#allocation5 + $0x38] sm:$0xff]   ;;  %v2666_v35 = vld [vmem:[#allocation5 + $0x140] sm:$0xff]  }
  0x64   :  { %2327 = vmatpush3.bf16.msra.mxu0 %v2641_v9  ;;  %v2658_v26 = vld [vmem:[#allocation5 + $0xf0] sm:$0xff]   ;;  %v2662_v30 = vld [vmem:[#allocation5 + $0xf8] sm:$0xff]   ;;  %v2669_v39 = vld [vmem:[#allocation5 + $0x100] sm:$0xff]  }
  0x65   :  { %2328 = vmatprep.subr.bf16.mxu0 %v2644_v12  ;;  %v2659_v27 = vld [vmem:[#allocation5 + $0xb0] sm:$0xff]   ;;  %v2665_v34 = vld [vmem:[#allocation5 + $0xb8] sm:$0xff]   ;;  %v2670_v40 = vld [vmem:[#allocation5 + $0x1c0] sm:$0xff]  }
  0x66   :  { %2349 = vmatpush3.bf16.msra.mxu1 %v2643_v11  ;;  %v100_v31 = vld [vmem:[#allocation2] sm:$0xff]  ;;  %v101_v36 = vld [vmem:[#allocation2 + $0x8] sm:$0xff]  ;;  %v2672_v42 = vld [vmem:[#allocation5 + $0x148] sm:$0xff]  }
  0x67   :  { %2350 = vmatprep.subr.bf16.mxu1 %v2646_v14  ;;  %v2129_v32 = vcombine.low %v100_v31, %v100_v31  ;;  %v2130_v33 = vcombine.high %v100_v31, %v100_v31  ;;  %v2131_v37 = vcombine.low %v101_v36, %v101_v36  ;;  %v2132_v38 = vcombine.high %v101_v36, %v101_v36  ;;  %v2671_v41 = vld [vmem:[#allocation5 + $0x180] sm:$0xff]   ;;  %v2673_v43 = vld [vmem:[#allocation5 + $0x108] sm:$0xff]   ;;  %v2676_v46 = vld [vmem:[#allocation5 + $0x150] sm:$0xff]  }
  0x68   :  { %2329 = vmatpush3.bf16.msra.mxu0 %v2645_v13  ;;  %v2674_v44 = vld [vmem:[#allocation5 + $0x1c8] sm:$0xff]   ;;  %v2677_v47 = vld [vmem:[#allocation5 + $0x110] sm:$0xff]   ;;  %v2680_v50 = vld [vmem:[#allocation5 + $0x158] sm:$0xff]  }
  0x69   :  { %2330 = vmatprep.subr.bf16.mxu0 %v2648_v16  ;;  %1395 = vmatprep.mubr.bf16.mxu0 %v2130_v33  ;;  %v2675_v45 = vld [vmem:[#allocation5 + $0x188] sm:$0xff]   ;;  %v2678_v48 = vld [vmem:[#allocation5 + $0x1d0] sm:$0xff]   ;;  %v2681_v51 = vld [vmem:[#allocation5 + $0x118] sm:$0xff]  }
  0x6a   :  { %2351 = vmatpush3.bf16.msra.mxu1 %v2647_v15  ;;  %1435 = vmatprep.mubr.bf16.mxu1 %v2132_v38  ;;  %v2679_v49 = vld [vmem:[#allocation5 + $0x190] sm:$0xff]   ;;  %v2682_v52 = vld [vmem:[#allocation5 + $0x1d8] sm:$0xff]   ;;  %v2684_v54 = vld [vmem:[#allocation5 + $0x160] sm:$0xff]  }
  0x6b   :  { %2352 = vmatprep.subr.bf16.mxu1 %v2650_v18  ;;  %v2683_v53 = vld [vmem:[#allocation5 + $0x198] sm:$0xff]   ;;  %v2685_v55 = vld [vmem:[#allocation5 + $0x120] sm:$0xff]   ;;  %v2688_v58 = vld [vmem:[#allocation5 + $0x168] sm:$0xff]  }
  0x6c   :  { %2331 = vmatpush3.bf16.msra.mxu0 %v2649_v17  ;;  %v2686_v56 = vld [vmem:[#allocation5 + $0x1e0] sm:$0xff]   ;;  %v2689_v59 = vld [vmem:[#allocation5 + $0x128] sm:$0xff]   ;;  %v2692_v62 = vld [vmem:[#allocation5 + $0x170] sm:$0xff]  }
  0x6d   :  { %2332 = vmatprep.subr.bf16.mxu0 %v2652_v20  ;;  %v2687_v57 = vld [vmem:[#allocation5 + $0x1a0] sm:$0xff]   ;;  %v2690_v60 = vld [vmem:[#allocation5 + $0x1e8] sm:$0xff]   ;;  %v2693_v63 = vld [vmem:[#allocation5 + $0x130] sm:$0xff]  }
  0x6e   :  { %2353 = vmatpush3.bf16.msra.mxu1 %v2651_v19  ;;  %v2691_v61 = vld [vmem:[#allocation5 + $0x1a8] sm:$0xff]   ;;  %v2694_v0 = vld [vmem:[#allocation5 + $0x1f0] sm:$0xff]   ;;  %v2696_v2 = vld [vmem:[#allocation5 + $0x178] sm:$0xff]  }
  0x6f   :  { %2354 = vmatprep.subr.bf16.mxu1 %v2654_v22  ;;  %v2695_v1 = vld [vmem:[#allocation5 + $0x1b0] sm:$0xff]   ;;  %v2697_v3 = vld [vmem:[#allocation5 + $0x138] sm:$0xff]   ;;  %v102_v5 = vld [vmem:[#allocation2 + $0x10] sm:$0xff] }
  0x70   :  { %2333 = vmatpush3.bf16.msra.mxu0 %v2653_v21  ;;  %v2698_v4 = vld [vmem:[#allocation5 + $0x1f8] sm:$0xff]   ;;  %v2133_v6 = vcombine.low %v102_v5, %v102_v5  ;;  %v2134_v7 = vcombine.high %v102_v5, %v102_v5  ;;  %v2702_v9 = vld [vmem:[#allocation5 + $0x240] sm:$0xff]   ;;  %v103_v10 = vld [vmem:[#allocation2 + $0x18] sm:$0xff] }
  0x71   :  { %2334 = vmatprep.subr.bf16.mxu0 %v2656_v24  ;;  %v2701_v8 = vld [vmem:[#allocation5 + $0x1b8] sm:$0xff]   ;;  %v2135_v11 = vcombine.low %v103_v10, %v103_v10  ;;  %v2136_v12 = vcombine.high %v103_v10, %v103_v10  ;;  %v2705_v13 = vld [vmem:[#allocation5 + $0x200] sm:$0xff]   ;;  %v2708_v16 = vld [vmem:[#allocation5 + $0x248] sm:$0xff]  }
  0x72   :  { %2355 = vmatpush3.bf16.msra.mxu1 %v2655_v23  ;;  %v2706_v14 = vld [vmem:[#allocation5 + $0x2c0] sm:$0xff]   ;;  %v2709_v17 = vld [vmem:[#allocation5 + $0x208] sm:$0xff]   ;;  %v2712_v20 = vld [vmem:[#allocation5 + $0x250] sm:$0xff]  }
  0x73   :  { %2356 = vmatprep.subr.bf16.mxu1 %v2658_v26  ;;  %v2707_v15 = vld [vmem:[#allocation5 + $0x280] sm:$0xff]   ;;  %v2710_v18 = vld [vmem:[#allocation5 + $0x2c8] sm:$0xff]   ;;  %v2713_v21 = vld [vmem:[#allocation5 + $0x210] sm:$0xff]  }
  0x74   :  { %2335 = vmatpush3.bf16.msra.mxu0 %v2657_v25  ;;  %v2711_v19 = vld [vmem:[#allocation5 + $0x288] sm:$0xff]   ;;  %v2714_v22 = vld [vmem:[#allocation5 + $0x2d0] sm:$0xff]   ;;  %v2716_v24 = vld [vmem:[#allocation5 + $0x258] sm:$0xff]  }
  0x75   :  { %2336 = vmatprep.subr.bf16.mxu0 %v2660_v28  ;;  %v2715_v23 = vld [vmem:[#allocation5 + $0x290] sm:$0xff]   ;;  %v2717_v25 = vld [vmem:[#allocation5 + $0x218] sm:$0xff]   ;;  %v2720_v28 = vld [vmem:[#allocation5 + $0x260] sm:$0xff]  }
  0x76   :  { %2357 = vmatpush3.bf16.msra.mxu1 %v2659_v27  ;;  %v2718_v26 = vld [vmem:[#allocation5 + $0x2d8] sm:$0xff]   ;;  %v2723_v31 = vld [vmem:[#allocation5 + $0x2a0] sm:$0xff]   ;;  %v2725_v33 = vld [vmem:[#allocation5 + $0x228] sm:$0xff]  }
  0x77   :  { %2358 = vmatprep.subr.bf16.mxu1 %v2662_v30  ;;  %v2719_v27 = vld [vmem:[#allocation5 + $0x298] sm:$0xff]   ;;  %v2722_v30 = vld [vmem:[#allocation5 + $0x2e0] sm:$0xff]   ;;  %v2728_v36 = vld [vmem:[#allocation5 + $0x270] sm:$0xff]  }
  0x78   :  { %2337 = vmatpush3.bf16.msra.mxu0 %v2661_v29  ;;  %v2721_v29 = vld [vmem:[#allocation5 + $0x220] sm:$0xff]   ;;  %v2730_v38 = vld [vmem:[#allocation5 + $0x2f0] sm:$0xff]  }
  0x79   :  { %2366 = vmatprep.subr.bf16.mxu0 %v2666_v35  ;;  %v2727_v35 = vld [vmem:[#allocation5 + $0x2a8] sm:$0xff]   ;;  %v2759_v5 = vld [vmem:[#allocation5 + $0x3a0] sm:$0xff]   ;;  %v2764_v10 = vld [vmem:[#allocation5 + $0x370] sm:$0xff]  }
  0x7a   :  { %2359 = vmatpush3.bf16.msra.mxu1 %v2665_v34  ;;  %v2726_v34 = vld [vmem:[#allocation5 + $0x2e8] sm:$0xff]  }
  0x7b   :  { %1396 = vmatmul.mubr.bf16.vlgmr.msra.gmra.mrb[0].mxu0 %v2129_v32  ;;  %2388 = vmatprep.subr.bf16.mxu1 %v2670_v40  ;;  %v2724_v32 = vld [vmem:[#allocation5 + $0x268] sm:$0xff]   ;;  %v2732_v40 = vld [vmem:[#allocation5 + $0x278] sm:$0xff]  }
  0x7c   :  { %2367 = vmatpush3.bf16.msra.mxu0 %v2669_v39  ;;  %1475 = vmatprep.mubr.bf16.mxu0 %v2134_v7  ;;  %v2731_v39 = vld [vmem:[#allocation5 + $0x2b0] sm:$0xff]   ;;  %v2761_v7 = vld [vmem:[#allocation5 + $0x328] sm:$0xff]  }
  0x7d   :  { %1436 = vmatmul.mubr.bf16.vlgmr.msra.gmra.mrb[0].mxu1 %v2131_v37  ;;  %2368 = vmatprep.subr.bf16.mxu0 %v2672_v42  ;;  %v2729_v37 = vld [vmem:[#allocation5 + $0x230] sm:$0xff]   ;;  %v2734_v42 = vld [vmem:[#allocation5 + $0x2f8] sm:$0xff]  }
  0x7e   :  { %2389 = vmatpush3.bf16.msra.mxu1 %v2671_v41  ;;  %1515 = vmatprep.mubr.bf16.mxu1 %v2136_v12  ;;  %v2733_v41 = vld [vmem:[#allocation5 + $0x238] sm:$0xff]   ;;  %v2766_v12 = vld [vmem:[#allocation5 + $0x3f0] sm:$0xff]  }
  0x7f   :  { %2390 = vmatprep.subr.bf16.mxu1 %v2674_v44 }
  0x80   :  { %2369 = vmatpush3.bf16.msra.mxu0 %v2673_v43  ;;  %v104_v43 = vld [vmem:[#allocation2 + $0x20] sm:$0xff] }
  0x81   :  { %2370 = vmatprep.subr.bf16.mxu0 %v2676_v46  ;;  %v2137_v44 = vcombine.low %v104_v43, %v104_v43  ;;  %v2737_v46 = vld [vmem:[#allocation5 + $0x2b8] sm:$0xff]  }
  0x82   :  { %2391 = vmatpush3.bf16.msra.mxu1 %v2675_v45  ;;  %v2138_v45 = vcombine.high %v104_v43, %v104_v43  ;;  %v2797_v43 = vld [vmem:[#allocation2 + $0x48] ss:$0 sps:$4 sm:$0xff]  }
  0x83   :  { %2392 = vmatprep.subr.bf16.mxu1 %v2678_v48  ;;  %v105_v48 = vld [vmem:[#allocation2 + $0x28] sm:$0xff] }
  0x84   :  { %2371 = vmatpush3.bf16.msra.mxu0 %v2677_v47  ;;  %v2738_v47 = vld [vmem:[#allocation5 + $0x340] sm:$0xff]  }
  0x85   :  { %2372 = vmatprep.subr.bf16.mxu0 %v2680_v50  ;;  %v2140_v50 = vcombine.high %v105_v48, %v105_v48 }
  0x86   :  { %2393 = vmatpush3.bf16.msra.mxu1 %v2679_v49  ;;  %v2139_v49 = vcombine.low %v105_v48, %v105_v48  ;;  %v2798_v48 = vld [vmem:[#allocation7] sm:$0xff]  }
  0x87   :  { %2394 = vmatprep.subr.bf16.mxu1 %v2682_v52  ;;  %v2742_v52 = vld [vmem:[#allocation5 + $0x3c0] sm:$0xff]  }
  0x88   :  { %2373 = vmatpush3.bf16.msra.mxu0 %v2681_v51  ;;  %v2741_v51 = vld [vmem:[#allocation5 + $0x300] sm:$0xff]  }
  0x89   :  { %2374 = vmatprep.subr.bf16.mxu0 %v2684_v54  ;;  %v2744_v54 = vld [vmem:[#allocation5 + $0x348] sm:$0xff]  }
  0x8a   :  { %2395 = vmatpush3.bf16.msra.mxu1 %v2683_v53  ;;  %v2743_v53 = vld [vmem:[#allocation5 + $0x380] sm:$0xff]  }
  0x8b   :  { %2396 = vmatprep.subr.bf16.mxu1 %v2686_v56  ;;  %v2746_v56 = vld [vmem:[#allocation5 + $0x3c8] sm:$0xff]  }
  0x8c   :  { %2375 = vmatpush3.bf16.msra.mxu0 %v2685_v55  ;;  %v2745_v55 = vld [vmem:[#allocation5 + $0x308] sm:$0xff]  }
  0x8d   :  { %2376 = vmatprep.subr.bf16.mxu0 %v2688_v58  ;;  %v2748_v58 = vld [vmem:[#allocation5 + $0x350] sm:$0xff]  }
  0x8e   :  { %2397 = vmatpush3.bf16.msra.mxu1 %v2687_v57  ;;  %v2747_v57 = vld [vmem:[#allocation5 + $0x388] sm:$0xff]  }
  0x8f   :  { %2398 = vmatprep.subr.bf16.mxu1 %v2690_v60  ;;  %v2750_v60 = vld [vmem:[#allocation5 + $0x3d0] sm:$0xff]  }
  0x90   :  { %2377 = vmatpush3.bf16.msra.mxu0 %v2689_v59  ;;  %v2749_v59 = vld [vmem:[#allocation5 + $0x310] sm:$0xff]  }
  0x91   :  { %2378 = vmatprep.subr.bf16.mxu0 %v2692_v62  ;;  %v2752_v62 = vld [vmem:[#allocation5 + $0x358] sm:$0xff]  }
  0x92   :  { %2399 = vmatpush3.bf16.msra.mxu1 %v2691_v61  ;;  %v2751_v61 = vld [vmem:[#allocation5 + $0x390] sm:$0xff]  }
  0x93   :  { %2400 = vmatprep.subr.bf16.mxu1 %v2694_v0  ;;  %v2754_v0 = vld [vmem:[#allocation5 + $0x3d8] sm:$0xff]  }
  0x94   :  { %2379 = vmatpush3.bf16.msra.mxu0 %v2693_v63  ;;  %v2753_v63 = vld [vmem:[#allocation5 + $0x318] sm:$0xff]  }
  0x95   :  { %2380 = vmatprep.subr.bf16.mxu0 %v2696_v2  ;;  %v2756_v2 = vld [vmem:[#allocation5 + $0x360] sm:$0xff]  }
  0x96   :  { %2401 = vmatpush3.bf16.msra.mxu1 %v2695_v1  ;;  %v2755_v1 = vld [vmem:[#allocation5 + $0x398] sm:$0xff]  }
  0x97   :  { %2402 = vmatprep.subr.bf16.mxu1 %v2698_v4  ;;  %v2758_v4 = vld [vmem:[#allocation5 + $0x3e0] sm:$0xff]  }
  0x98   :  { %2381 = vmatpush3.bf16.msra.mxu0 %v2697_v3  ;;  %v2757_v3 = vld [vmem:[#allocation5 + $0x320] sm:$0xff]  }
  0x99   :  { %2410 = vmatprep.subr.bf16.mxu0 %v2702_v9  ;;  %v2763_v9 = vld [vmem:[#allocation5 + $0x3a8] sm:$0xff]  }
  0x9a   :  { %2403 = vmatpush3.bf16.msra.mxu1 %v2701_v8  ;;  %v2762_v8 = vld [vmem:[#allocation5 + $0x3e8] sm:$0xff]  }
  0x9b   :  { %1476 = vmatmul.mubr.bf16.vlgmr.msra.gmra.mrb[4].mxu0 %v2133_v6  ;;  %2432 = vmatprep.subr.bf16.mxu1 %v2706_v14  ;;  %v2760_v6 = vld [vmem:[#allocation5 + $0x368] sm:$0xff]   ;;  %v2768_v14 = vld [vmem:[#allocation5 + $0x378] sm:$0xff]  }
  0x9c   :  { %2411 = vmatpush3.bf16.msra.mxu0 %v2705_v13  ;;  %1555 = vmatprep.mubr.bf16.mxu0 %v2138_v45  ;;  %v2767_v13 = vld [vmem:[#allocation5 + $0x3b0] sm:$0xff]   ;;  %v2792_v45 = vld [vmem:[#allocation5 + $0x478] sm:$0xff]  }
  0x9d   :  { %1516 = vmatmul.mubr.bf16.vlgmr.msra.gmra.mrb[4].mxu1 %v2135_v11  ;;  %2412 = vmatprep.subr.bf16.mxu0 %v2708_v16  ;;  %v2765_v11 = vld [vmem:[#allocation5 + $0x330] sm:$0xff]   ;;  %v2770_v16 = vld [vmem:[#allocation5 + $0x3f8] sm:$0xff]  }
  0x9e   :  { %2433 = vmatpush3.bf16.msra.mxu1 %v2707_v15  ;;  %1595 = vmatprep.mubr.bf16.mxu1 %v2140_v50  ;;  %v2769_v15 = vld [vmem:[#allocation5 + $0x338] sm:$0xff]   ;;  %v2800_v50 = vld [vmem:[#allocation7 + $0x10] sm:$0xff]  }
  0x9f   :  { %2434 = vmatprep.subr.bf16.mxu1 %v2710_v18 }
  0xa0   :  { %2413 = vmatpush3.bf16.msra.mxu0 %v2709_v17  ;;  %v106_v17 = vld [vmem:[#allocation2 + $0x30] sm:$0xff] }
  0xa1   :  { %2414 = vmatprep.subr.bf16.mxu0 %v2712_v20  ;;  %v2141_v18 = vcombine.low %v106_v17, %v106_v17  ;;  %v2773_v20 = vld [vmem:[#allocation5 + $0x3b8] sm:$0xff]  }
  0xa2   :  { %2435 = vmatpush3.bf16.msra.mxu1 %v2711_v19  ;;  %v2142_v19 = vcombine.high %v106_v17, %v106_v17 }
  0xa3   :  { %2436 = vmatprep.subr.bf16.mxu1 %v2714_v22  ;;  %v107_v22 = vld [vmem:[#allocation2 + $0x38] sm:$0xff] }
  0xa4   :  { %2415 = vmatpush3.bf16.msra.mxu0 %v2713_v21  ;;  %v2774_v21 = vld [vmem:[#allocation5 + $0x440] sm:$0xff]  }
  0xa5   :  { %2416 = vmatprep.subr.bf16.mxu0 %v2716_v24  ;;  %v2144_v24 = vcombine.high %v107_v22, %v107_v22 }
  0xa6   :  { %2437 = vmatpush3.bf16.msra.mxu1 %v2715_v23  ;;  %v2143_v23 = vcombine.low %v107_v22, %v107_v22 }
  0xa7   :  { %2438 = vmatprep.subr.bf16.mxu1 %v2718_v26  ;;  %v2778_v26 = vld [vmem:[#allocation5 + $0x448] sm:$0xff]  }
  0xa8   :  { %2417 = vmatpush3.bf16.msra.mxu0 %v2717_v25  ;;  %v2777_v25 = vld [vmem:[#allocation5 + $0x400] sm:$0xff]  }
  0xa9   :  { %2418 = vmatprep.subr.bf16.mxu0 %v2720_v28  ;;  %v2780_v28 = vld [vmem:[#allocation5 + $0x450] sm:$0xff]  }
  0xaa   :  { %2439 = vmatpush3.bf16.msra.mxu1 %v2719_v27  ;;  %v2779_v27 = vld [vmem:[#allocation5 + $0x408] sm:$0xff]  }
  0xab   :  { %2440 = vmatprep.subr.bf16.mxu1 %v2722_v30  ;;  %v2781_v30 = vld [vmem:[#allocation5 + $0x410] sm:$0xff]  }
  0xac   :  { %2419 = vmatpush3.bf16.msra.mxu0 %v2721_v29  ;;  %v2993_v29 = vmov 0.0  }
  0xad   :  { %2420 = vmatprep.subr.bf16.mxu0 %v2724_v32  ;;  %v2783_v32 = vld [vmem:[#allocation5 + $0x418] sm:$0xff]  }
  0xae   :  { %2441 = vmatpush3.bf16.msra.mxu1 %v2723_v31  ;;  %v2782_v31 = vld [vmem:[#allocation5 + $0x458] sm:$0xff]  }
  0xaf   :  { %2442 = vmatprep.subr.bf16.mxu1 %v2726_v34  ;;  %v2788_v34 = vld [vmem:[#allocation5 + $0x480] sm:$0xff]  }
  0xb0   :  { %2421 = vmatpush3.bf16.msra.mxu0 %v2725_v33  ;;  %v2784_v33 = vld [vmem:[#allocation5 + $0x460] sm:$0xff]  }
  0xb1   :  { %2422 = vmatprep.subr.bf16.mxu0 %v2728_v36  ;;  %v2791_v36 = vld [vmem:[#allocation5 + $0x488] sm:$0xff]  }
  0xb2   :  { %2443 = vmatpush3.bf16.msra.mxu1 %v2727_v35  ;;  %v2785_v35 = vld [vmem:[#allocation5 + $0x420] sm:$0xff]  }
  0xb3   :  { %2444 = vmatprep.subr.bf16.mxu1 %v2730_v38  ;;  %v2787_v38 = vld [vmem:[#allocation5 + $0x428] sm:$0xff]  }
  0xb4   :  { %2423 = vmatpush3.bf16.msra.mxu0 %v2729_v37  ;;  %v2786_v37 = vld [vmem:[#allocation5 + $0x468] sm:$0xff]  }
  0xb5   :  { %2424 = vmatprep.subr.bf16.mxu0 %v2732_v40 }
  0xb6   :  { %2445 = vmatpush3.bf16.msra.mxu1 %v2731_v39  ;;  %v108_v39 = vld [vmem:[#allocation2 + $0x40] sm:$0xff] }
  0xb7   :  { %2446 = vmatprep.subr.bf16.mxu1 %v2734_v42  ;;  %v2146_v40 = vcombine.high %v108_v39, %v108_v39  ;;  %v2789_v42 = vld [vmem:[#allocation5 + $0x470] sm:$0xff]  }
  0xb8   :  { %2425 = vmatpush3.bf16.msra.mxu0 %v2733_v41  ;;  %v2796_v41 = vld [vmem:[#allocation5 + $0x490] sm:$0xff]  }
  0xb9   :  { %2454 = vmatprep.subr.bf16.mxu0 %v2738_v47  ;;  %v2145_v47 = vcombine.low %v108_v39, %v108_v39 }
  0xba   :  { %2447 = vmatpush3.bf16.msra.mxu1 %v2737_v46  ;;  %v2793_v46 = vld [vmem:[#allocation5 + $0x438] sm:$0xff]  }
  0xbb   :  { %1556 = vmatmul.mubr.bf16.vlgmr.msra.gmra.mrb[8].mxu0 %v2137_v44  ;;  %2476 = vmatprep.subr.bf16.mxu1 %v2742_v52  ;;  %v2790_v44 = vld [vmem:[#allocation5 + $0x430] sm:$0xff]   ;;  %v2802_v52 = vld [vmem:[#allocation7 + $0x20] sm:$0xff]  }
  0xbc   :  { %2455 = vmatpush3.bf16.msra.mxu0 %v2741_v51  ;;  %1635 = vmatprep.mubr.bf16.mxu0 %v2142_v19  ;;  %v2801_v51 = vld [vmem:[#allocation7 + $0x18] sm:$0xff]  }
  0xbd   :  { %1596 = vmatmul.mubr.bf16.vlgmr.msra.gmra.mrb[8].mxu1 %v2139_v49  ;;  %2456 = vmatprep.subr.bf16.mxu0 %v2744_v54  ;;  %v2799_v49 = vld [vmem:[#allocation7 + $0x8] sm:$0xff]   ;;  %v2128_v54 = vld [vmem:[%s3189_s2] ss:$0 sm:$0xff] }
  0xbe   :  { %2477 = vmatpush3.bf16.msra.mxu1 %v2743_v53  ;;  %1675 = vmatprep.mubr.bf16.mxu1 %v2144_v24 }
  0xbf   :  { %2478 = vmatprep.subr.bf16.mxu1 %v2746_v56  ;;  %v2803_v56 = vld [vmem:[#allocation7 + $0x28] sm:$0xff]  }
  0xc0   :  { %2457 = vmatpush3.bf16.msra.mxu0 %v2745_v55 }
  0xc1   :  { %2458 = vmatprep.subr.bf16.mxu0 %v2748_v58 }
  0xc2   :  { %2479 = vmatpush3.bf16.msra.mxu1 %v2747_v57 }
  0xc3   :  { %2480 = vmatprep.subr.bf16.mxu1 %v2750_v60 }
  0xc4   :  { %2459 = vmatpush3.bf16.msra.mxu0 %v2749_v59 }
  0xc5   :  { %2460 = vmatprep.subr.bf16.mxu0 %v2752_v62 }
  0xc6   :  { %2481 = vmatpush3.bf16.msra.mxu1 %v2751_v61 }
  0xc7   :  { %2482 = vmatprep.subr.bf16.mxu1 %v2754_v0 }
  0xc8   :  { %2461 = vmatpush3.bf16.msra.mxu0 %v2753_v63 }
  0xc9   :  { %2462 = vmatprep.subr.bf16.mxu0 %v2756_v2  ;;  %v2804_v2 = vld [vmem:[#allocation7 + $0x30] sm:$0xff]  }
  0xca   :  { %2483 = vmatpush3.bf16.msra.mxu1 %v2755_v1 }
  0xcb   :  { %2484 = vmatprep.subr.bf16.mxu1 %v2758_v4  ;;  %v2805_v4 = vld [vmem:[#allocation7 + $0x38] sm:$0xff]  }
  0xcc   :  { %2463 = vmatpush3.bf16.msra.mxu0 %v2757_v3 }
  0xcd   :  { %2464 = vmatprep.subr.bf16.mxu0 %v2760_v6  ;;  %v2807_v6 = vld [vmem:[#allocation8 + $0x8] sm:$0xff]  }
  0xce   :  { %2485 = vmatpush3.bf16.msra.mxu1 %v2759_v5  ;;  %v2806_v5 = vld [vmem:[#allocation8] sm:$0xff]  }
  0xcf   :  { %2486 = vmatprep.subr.bf16.mxu1 %v2762_v8  ;;  %v2809_v8 = vld [vmem:[#allocation8 + $0x18] sm:$0xff]  }
  0xd0   :  { %2465 = vmatpush3.bf16.msra.mxu0 %v2761_v7  ;;  %v2808_v7 = vld [vmem:[#allocation8 + $0x10] sm:$0xff]  }
  0xd1   :  { %2466 = vmatprep.subr.bf16.mxu0 %v2764_v10 }
  0xd2   :  { %2487 = vmatpush3.bf16.msra.mxu1 %v2763_v9  ;;  %v2810_v9 = vld [vmem:[#allocation8 + $0x20] sm:$0xff]  }
  0xd3   :  { %2488 = vmatprep.subr.bf16.mxu1 %v2766_v12 }
  0xd4   :  { %2467 = vmatpush3.bf16.msra.mxu0 %v2765_v11  ;;  %v2811_v11 = vld [vmem:[#allocation8 + $0x28] sm:$0xff]  }
  0xd5   :  { %2468 = vmatprep.subr.bf16.mxu0 %v2768_v14 }
  0xd6   :  { %2489 = vmatpush3.bf16.msra.mxu1 %v2767_v13 }
  0xd7   :  { %2490 = vmatprep.subr.bf16.mxu1 %v2770_v16 }
  0xd8   :  { %2469 = vmatpush3.bf16.msra.mxu0 %v2769_v15 }
  0xd9   :  { %2498 = vmatprep.subr.bf16.mxu0 %v2774_v21 }
  0xda   :  { %2491 = vmatpush3.bf16.msra.mxu1 %v2773_v20 }
  0xdb   :  { %1636 = vmatmul.mubr.bf16.vlgmr.msra.gmra.mrb[12].mxu0 %v2141_v18  ;;  %2551 = vmatprep.subr.bf16.mxu1 %v2993_v29 }
  0xdc   :  { %2499 = vmatpush3.bf16.msra.mxu0 %v2777_v25  ;;  %1715 = vmatprep.mubr.bf16.mxu0 %v2146_v40 }
  0xdd   :  { %1676 = vmatmul.mubr.bf16.vlgmr.msra.gmra.mrb[12].mxu1 %v2143_v23  ;;  %2500 = vmatprep.subr.bf16.mxu0 %v2778_v26 }
  0xde   :  { %2557 = vmatprep.mubr.msk.bf16.mxu1 %vm2994_vm0, %v2993_v29  ;;  %2552 = vmatpush3.bf16.msra.mxu1 %v2788_v34 }
  0xdf   :  { %2553 = vmatprep.subr.bf16.mxu1 %v2993_v29 }
  0xe0   :  { %2501 = vmatpush3.bf16.msra.mxu0 %v2779_v27 }
  0xe1   :  { %2502 = vmatprep.subr.bf16.mxu0 %v2780_v28 }
  0xe2   :  { %2554 = vmatpush3.bf16.msra.mxu1 %v2791_v36 }
  0xe3   :  { %2555 = vmatprep.subr.bf16.mxu1 %v2993_v29 }
  0xe4   :  { %2503 = vmatpush3.bf16.msra.mxu0 %v2781_v30 }
  0xe5   :  { %2504 = vmatprep.subr.bf16.mxu0 %v2782_v31 }
  0xe6   :  { %2556 = vmatpush3.bf16.msra.mxu1 %v2796_v41 }
  0xe7   :  { %2561 = vmatprep.subr.bf16.mxu1 %v2993_v29 }
  0xe8   :  { %2505 = vmatpush3.bf16.msra.mxu0 %v2783_v32 }
  0xe9   :  { %2506 = vmatprep.subr.bf16.mxu0 %v2784_v33  ;;  %2558 = vmatmul.mubr.msk.bf16.vlgmr.msra.gmra.mrb[16].mxu1 %vm1359_vm1, %v2797_v43 }
  0xea   :  { %2577 = vmatprep.mubr.msk.bf16.mxu1 %vm2994_vm0, %v2993_v29  ;;  %2562 = vmatpush3.bf16.msra.mxu1 %v2798_v48 }
  0xeb   :  { %2563 = vmatprep.subr.bf16.mxu1 %v2993_v29 }
  0xec   :  { %2507 = vmatpush3.bf16.msra.mxu0 %v2785_v35 }
  0xed   :  { %2508 = vmatprep.subr.bf16.mxu0 %v2786_v37 }
  0xee   :  { %2564 = vmatpush3.bf16.msra.mxu1 %v2799_v49 }
  0xef   :  { %2565 = vmatprep.subr.bf16.mxu1 %v2993_v29 }
  0xf0   :  { %2509 = vmatpush3.bf16.msra.mxu0 %v2787_v38 }
  0xf1   :  { %2510 = vmatprep.subr.bf16.mxu0 %v2789_v42 }
  0xf2   :  { %2566 = vmatpush3.bf16.msra.mxu1 %v2800_v50 }
  0xf3   :  { %2567 = vmatprep.subr.bf16.mxu1 %v2993_v29 }
  0xf4   :  { %2511 = vmatpush3.bf16.msra.mxu0 %v2790_v44 }
  0xf5   :  { %2512 = vmatprep.subr.bf16.mxu0 %v2792_v45 }
  0xf6   :  { %2568 = vmatpush3.bf16.msra.mxu1 %v2801_v51 }
  0xf7   :  { %2569 = vmatprep.subr.bf16.mxu1 %v2993_v29 }
  0xf8   :  { %2513 = vmatpush3.bf16.msra.mxu0 %v2793_v46 }
  0xf9   :  { %2581 = vmatprep.subr.bf16.mxu0 %v2993_v29 }
  0xfa   :  { %2570 = vmatpush3.bf16.msra.mxu1 %v2802_v52 }
  0xfb   :  { %1716 = vmatmul.mubr.bf16.vlgmr.msra.gmra.mrb[16].mxu0 %v2145_v47  ;;  %2571 = vmatprep.subr.bf16.mxu1 %v2993_v29 }
  0xfc   :  { %2597 = vmatprep.mubr.msk.bf16.mxu0 %vm2994_vm0, %v2993_v29  ;;  %2582 = vmatpush3.bf16.msra.mxu0 %v2806_v5  ;;  %v2296_v5 = vld [vmem:[%s3191_s4] ss:$0 sm:$0xff]  ;;  %s2995_s4 = smov [#allocation12]  }
  0xfd   :  { %2583 = vmatprep.subr.bf16.mxu0 %v2993_v29  ;;  %s2113_s30 = sshll.u32 %s2995_s4, 4  ;;  %s2114_s30 = int_to_ptr.vmem [resolvable:$true] %s2113_s30 }
  0xfe   :  { %2572 = vmatpush3.bf16.msra.mxu1 %v2803_v56  ;;  %s2932_s11 = scalar_lea.vmem %s2114_s30, 128  ;;  %p2937_p13 = scmp.lt.s32.totalorder %s2114_s30, %s2114_s30 }
  0xff   :  { %2573 = vmatprep.subr.bf16.mxu1 %v2993_v29  ;;  %p2933_p12 = scmp.ne.s32.totalorder %s2114_s30, %s2932_s11  ;;  %p2938_p0 = scmp.lt.s32.totalorder %s2932_s11, %s2932_s11 }
 0x100   :  { %2584 = vmatpush3.bf16.msra.mxu0 %v2807_v6 }
 0x101   :  { %2585 = vmatprep.subr.bf16.mxu0 %v2993_v29  ;;  %p2939_p1 = por %p2938_p0, %p2937_p13 }
 0x102   :  { %2574 = vmatpush3.bf16.msra.mxu1 %v2804_v2  ;;  %v2817_v2 = vld [vmem:[#allocation10 + $0x18] sm:$0xff]  }
 0x103   :  { %2575 = vmatprep.subr.bf16.mxu1 %v2993_v29  ;;  %p2940_p2 = pnand %p2939_p1, %p2933_p12 }
 0x104   :  { %2586 = vmatpush3.bf16.msra.mxu0 %v2808_v7 }
 0x105   :  { %2587 = vmatprep.subr.bf16.mxu0 %v2993_v29 }
 0x106   :  { %2576 = vmatpush3.bf16.msra.mxu1 %v2805_v4  ;;  %v2819_v4 = vld [vmem:[#allocation10 + $0x28] sm:$0xff]  }
 0x107   :  { %2601 = vmatprep.subr.bf16.mxu1 %v2993_v29 }
 0x108   :  { %2588 = vmatpush3.bf16.msra.mxu0 %v2809_v8 }
 0x109   :  { %2589 = vmatprep.subr.bf16.mxu0 %v2993_v29 }
 0x10c   :  { %2590 = vmatpush3.bf16.msra.mxu0 %v2810_v9 }
 0x10d   :  { %2591 = vmatprep.subr.bf16.mxu0 %v2993_v29 }
 0x110   :  { %2592 = vmatpush3.bf16.msra.mxu0 %v2811_v11 }
 0x111   :  { %2593 = vmatprep.subr.bf16.mxu0 %v2993_v29 }
 0x14e   :  { %v2338_v53 = vpop.f32.mrb[0].mxu0 }
 0x14f   :  { %v2339_v55 = vpop.f32.mrb[1].mxu0 }
 0x150   :  { %v2340_v57 = vadd.f32 %v2339_v55, %v2338_v53  ;;  %v2341_v58 = vpop.f32.mrb[2].mxu0  ;;  %v2360_v59 = vpop.f32.mrb[0].mxu1 }
 0x151   :  { %v2342_v60 = vpop.f32.mrb[3].mxu0  ;;  %v2361_v61 = vpop.f32.mrb[1].mxu1 }
 0x152   :  { %v1398_v62 = vadd.f32 %v2340_v57, %v2128_v54  ;;  %v2362_v63 = vadd.f32 %v2361_v61, %v2360_v59  ;;  %v2363_v0 = vpop.f32.mrb[2].mxu1  ;;  %v2812_v61 = vld [vmem:[#allocation8 + $0x30] sm:$0xff]  }
 0x153   :  { %v2364_v1 = vpop.f32.mrb[3].mxu1  ;;  %2594 = vmatpush3.bf16.msra.mxu0 %v2812_v61  ;;  %v2815_v0 = vld [vmem:[#allocation10 + $0x8] sm:$0xff]  }
 0x154   :  { %v1438_v3 = vadd.f32 %v2362_v63, %v1398_v62  ;;  %2595 = vmatprep.subr.bf16.mxu0 %v2993_v29  ;;  %v2813_v62 = vld [vmem:[#allocation8 + $0x38] sm:$0xff]   ;;  %v2814_v63 = vld [vmem:[#allocation10] sm:$0xff]   ;;  %v2816_v1 = vld [vmem:[#allocation10 + $0x10] sm:$0xff]  }
 0x157   :  { %2596 = vmatpush3.bf16.msra.mxu0 %v2813_v62 }
 0x16e   :  { %v2382_v10 = vpop.f32.mrb[4].mxu0 }
 0x16f   :  { %v2383_v12 = vpop.f32.mrb[5].mxu0 }
 0x170   :  { %v2384_v13 = vadd.f32 %v2383_v12, %v2382_v10  ;;  %v2385_v14 = vpop.f32.mrb[6].mxu0  ;;  %v2404_v15 = vpop.f32.mrb[4].mxu1 }
 0x171   :  { %v2386_v16 = vpop.f32.mrb[7].mxu0  ;;  %v2405_v18 = vpop.f32.mrb[5].mxu1  ;;  %v2821_v14 = vld [vmem:[#allocation10 + $0x38] sm:$0xff]  }
 0x172   :  { %v1478_v17 = vadd.f32 %v2384_v13, %v1438_v3  ;;  %v2406_v19 = vadd.f32 %v2405_v18, %v2404_v15  ;;  %v2407_v20 = vpop.f32.mrb[6].mxu1  ;;  %v2818_v3 = vld [vmem:[#allocation10 + $0x20] sm:$0xff]   ;;  %v2820_v13 = vld [vmem:[#allocation10 + $0x30] sm:$0xff]   ;;  %v2305_v15 = vld [vmem:[%s3193_s6] ss:$0 sm:$0xff] }
 0x173   :  { %v2408_v21 = vpop.f32.mrb[7].mxu1 }
 0x174   :  { %v1518_v22 = vadd.f32 %v2406_v19, %v1478_v17 }
 0x18e   :  { %v2426_v23 = vpop.f32.mrb[8].mxu0 }
 0x18f   :  { %v2427_v24 = vpop.f32.mrb[9].mxu0 }
 0x190   :  { %v2428_v25 = vadd.f32 %v2427_v24, %v2426_v23  ;;  %v2429_v26 = vpop.f32.mrb[10].mxu0  ;;  %v2448_v27 = vpop.f32.mrb[8].mxu1 }
 0x191   :  { %v2430_v28 = vpop.f32.mrb[11].mxu0  ;;  %v2449_v30 = vpop.f32.mrb[9].mxu1 }
 0x192   :  { %v1558_v31 = vadd.f32 %v2428_v25, %v1518_v22  ;;  %v2450_v32 = vadd.f32 %v2449_v30, %v2448_v27  ;;  %v2451_v33 = vpop.f32.mrb[10].mxu1 }
 0x193   :  { %v2452_v34 = vpop.f32.mrb[11].mxu1 }
 0x194   :  { %v1598_v35 = vadd.f32 %v2450_v32, %v1558_v31 }
 0x1ae   :  { %v2470_v36 = vpop.f32.mrb[12].mxu0 }
 0x1af   :  { %v2471_v37 = vpop.f32.mrb[13].mxu0 }
 0x1b0   :  { %v2472_v38 = vadd.f32 %v2471_v37, %v2470_v36  ;;  %v2473_v39 = vpop.f32.mrb[14].mxu0  ;;  %v2492_v40 = vpop.f32.mrb[12].mxu1 }
 0x1b1   :  { %v2474_v41 = vpop.f32.mrb[15].mxu0  ;;  %v2493_v42 = vpop.f32.mrb[13].mxu1 }
 0x1b2   :  { %v1638_v43 = vadd.f32 %v2472_v38, %v1598_v35  ;;  %v2494_v44 = vadd.f32 %v2493_v42, %v2492_v40  ;;  %v2495_v45 = vpop.f32.mrb[14].mxu1 }
 0x1b3   :  { %v2496_v46 = vpop.f32.mrb[15].mxu1 }
 0x1b4   :  { %v1678_v47 = vadd.f32 %v2494_v44, %v1638_v43 }
 0x1bc   :  { %v1757_v48 = vpop.f32.mrb[16].mxu1 }
 0x1bd   :  { %v2559_v49 = vpop.f32.mrb[17].mxu1 }
 0x1be   :  { %v1760_v50 = vpop.f32.mrb[18].mxu1 }
 0x1bf   :  { %v2560_v51 = vpop.f32.mrb[19].mxu1 }
 0x1ce   :  { %v2514_v52 = vpop.f32.mrb[16].mxu0 }
 0x1cf   :  { %v2515_v53 = vpop.f32.mrb[17].mxu0 }
 0x1d0   :  { %v2516_v54 = vadd.f32 %v2515_v53, %v2514_v52  ;;  %v2517_v55 = vpop.f32.mrb[18].mxu0 }
 0x1d1   :  { %v2518_v56 = vpop.f32.mrb[19].mxu0 }
 0x1d2   :  { %v1718_v57 = vadd.f32 %v2516_v54, %v1678_v47 }
 0x1d4   :  { %v1758_v58 = vadd.f32 %v1757_v48, %v1718_v57 }
 0x1d6   :  { %v1763_v59 = vmax.f32 %v1758_v58, 0.0 }
 0x1d8   :  { %v1764_v60 = vpack.c.bf16 %v1763_v59, %v1763_v59 }
 0x1da   :  { %2578 = vmatmul.mubr.bf16.vlgmr.msra.gmra.mrb[20].mxu1 %v1764_v60 }
 0x1db   :  { %2617 = vmatprep.mubr.msk.bf16.mxu1 %vm2994_vm0, %v2993_v29  ;;  %2602 = vmatpush3.bf16.msra.mxu1 %v2814_v63 }
 0x1dc   :  { %2603 = vmatprep.subr.bf16.mxu1 %v2993_v29 }
 0x1df   :  { %2604 = vmatpush3.bf16.msra.mxu1 %v2815_v0 }
 0x1e0   :  { %2605 = vmatprep.subr.bf16.mxu1 %v2993_v29 }
 0x1e3   :  { %2606 = vmatpush3.bf16.msra.mxu1 %v2816_v1 }
 0x1e4   :  { %2607 = vmatprep.subr.bf16.mxu1 %v2993_v29 }
 0x1e7   :  { %2608 = vmatpush3.bf16.msra.mxu1 %v2817_v2 }
 0x1e8   :  { %2609 = vmatprep.subr.bf16.mxu1 %v2993_v29 }
 0x1eb   :  { %2610 = vmatpush3.bf16.msra.mxu1 %v2818_v3 }
 0x1ec   :  { %2611 = vmatprep.subr.bf16.mxu1 %v2993_v29 }
 0x1ef   :  { %2612 = vmatpush3.bf16.msra.mxu1 %v2819_v4 }
 0x1f0   :  { %2613 = vmatprep.subr.bf16.mxu1 %v2993_v29 }
 0x1f3   :  { %2614 = vmatpush3.bf16.msra.mxu1 %v2820_v13 }
 0x1f4   :  { %2615 = vmatprep.subr.bf16.mxu1 %v2993_v29 }
 0x1f7   :  { %2616 = vmatpush3.bf16.msra.mxu1 %v2821_v14 }
 0x2ad   :  { %v1870_v6 = vpop.f32.mrb[20].mxu1 }
 0x2ae   :  { %v1871_v7 = vadd.f32 %v2296_v5, %v1870_v6  ;;  %v2579_v8 = vpop.f32.mrb[21].mxu1 }
 0x2af   :  { %v1873_v9 = vpop.f32.mrb[22].mxu1 }
 0x2b0   :  { %v1876_v10 = vmax.f32 %v1871_v7, 0.0  ;;  %v2580_v11 = vpop.f32.mrb[23].mxu1 }
 0x2b2   :  { %v1877_v12 = vpack.c.bf16 %v1876_v10, %v1876_v10 }
 0x2b4   :  { %2598 = vmatmul.mubr.bf16.vlgmr.msra.gmra.mrb[20].mxu0 %v1877_v12 }
 0x387   :  { %v1983_v16 = vpop.f32.mrb[20].mxu0 }
 0x388   :  { %v1984_v17 = vadd.f32 %v2305_v15, %v1983_v16  ;;  %v2599_v18 = vpop.f32.mrb[21].mxu0 }
 0x389   :  { %v1986_v19 = vpop.f32.mrb[22].mxu0 }
 0x38a   :  { %v1989_v20 = vmax.f32 %v1984_v17, 0.0  ;;  %v2600_v21 = vpop.f32.mrb[23].mxu0 }
 0x38c   :  { %v1990_v22 = vpack.c.bf16 %v1989_v20, %v1989_v20  ;;  %2096 = vst [vmem:[#allocation12] sm:$0xff] %v1989_v20 }
 0x38e   :  { %2618 = vmatmul.mubr.bf16.vlgmr.msra.gmra.mrb[24].mxu1 %v1990_v22 }
 0x38f   :  { %2943 = shalt.err (!%p2940_p2)
}
 0x390   :  { %s2944_s13 = scalar_lea.hbm %s3196_s9, 128 }
 0x391   :  { %p2945_p3 = scmp.ne.s32.totalorder %s3196_s9, %s2944_s13  ;;  %p2948_p4 = scmp.lt.u32.totalorder %s2944_s13, %s3196_s9 }
 0x393   :  { %p2950_p5 = pnand %p2948_p4, %p2945_p3 }
 0x395   :  { %2953 = shalt.err (!%p2950_p5)
}
 0x396   :  { %2116 = dma.vmem_to_hbm [thread:$0]  %s2114_s30, 128, %s3196_s9, [#allocation13]  }
 0x397   :  { %s2996_s16 = smov [#allocation11]  }
 0x398   :  { %s2103_s17 = sshll.u32 %s2996_s16, 4  ;;  %s2104_s17 = int_to_ptr.vmem [resolvable:$true] %s2103_s17 }
 0x399   :  { %s2954_s18 = scalar_lea.vmem %s2104_s17, 128  ;;  %p2959_p7 = scmp.lt.s32.totalorder %s2104_s17, %s2104_s17 }
 0x39a   :  { %p2955_p6 = scmp.ne.s32.totalorder %s2104_s17, %s2954_s18  ;;  %p2960_p8 = scmp.lt.s32.totalorder %s2954_s18, %s2954_s18 }
 0x39c   :  { %p2961_p9 = por %p2960_p8, %p2959_p7 }
 0x39e   :  { %p2962_p10 = pnand %p2961_p9, %p2955_p6 }
 0x461   :  { %v2089_v29 = vpop.f32.mrb[24].mxu1 }
 0x462   :  { %2095 = vst [vmem:[#allocation11] sm:$0xff] %v2089_v29  ;;  %v2619_v23 = vpop.f32.mrb[25].mxu1 }
 0x463   :  { %v2092_v24 = vpop.f32.mrb[26].mxu1 }
 0x464   :  { %2965 = shalt.err (!%p2962_p10)
}
 0x465   :  { %s2966_s23 = scalar_lea.hbm %s3195_s8, 128 }
 0x466   :  { %p2967_p11 = scmp.ne.s32.totalorder %s3195_s8, %s2966_s23  ;;  %p2970_p12 = scmp.lt.u32.totalorder %s2966_s23, %s3195_s8 }
 0x468   :  { %p2972_p13 = pnand %p2970_p12, %p2967_p11 }
 0x46a   :  { %2975 = shalt.err (!%p2972_p13)
}
 0x46b   :  { %2106 = dma.vmem_to_hbm [thread:$0]  %s2104_s17, 128, %s3195_s8, [#allocation4]   ;;  %v2620_v25 = vpop.f32.mrb[27].mxu1 }
 0x46c   :  { %2982 = dma.done.wait [#allocation4], 128  }
 0x46d   :  { %2983 = vsyncadd [#allocation4], 4294967168 }
 0x46e   :  { %2984 = dma.done.wait [#allocation13], 128  }
 0x46f   :  { %2985 = vsyncadd [#allocation13], 4294967168 }
 0x470   :  { %2123 = vsyncpa [#allocation3], 1 }
 0x471   :  { %2124 = vsyncpa [#allocation6], 1 }
 0x472   :  { %2125 = vsyncpa [#allocation9], 1 }
 0x473   :  { %2126 = vsyncpa [#allocation4], 1 }
 0x474   :  { %2127 = vsyncpa [#allocation13], 1 }

</bundles_post_ra>
